<compile_context>
chip_gen: v7x
topology: tpu7x:2x2x1
jax: 0.10.0
libtpu: 0.0.40
codegen_flags: <defaults>
</compile_context>

<pallas_src>
import jax
import jax.numpy as jnp
from jax.experimental import pallas as pl
from jax.experimental.pallas import tpu as pltpu


def adaptive_norm_kernel(xs_ref, lens_ref, sb_ref, o_ref):
    # xs_ref:   (Bb, T, D)  input block (xs dtype)
    # lens_ref: (Bb, 1, 1)  int32 valid lengths
    # sb_ref:   (Bb, 2, D)  f32 per-utterance [scale; bias] (precomputed affine)
    # o_ref:    (Bb, T, D)  output block (xs dtype)
    x = xs_ref[...].astype(jnp.float32)                         # (Bb, T, D)
    T, D = x.shape[1], x.shape[2]

    lens = lens_ref[...]                                        # (Bb, 1, 1) i32
    # Lane-dense time index so the mask needs no cross-lane splat.
    t_idx = jax.lax.broadcasted_iota(jnp.int32, (1, T, D), 1)   # (1, T, D)
    mask = (t_idx < lens).astype(jnp.float32)                   # (Bb, T, D)

    # Guard zero-length utterances (reference would produce nan/inf).
    len_f = jnp.maximum(lens.astype(jnp.float32), 1.0)          # (Bb, 1, 1)

    # Two-pass, reference-faithful masked statistics (sublane reductions).
    mean = jnp.sum(x * mask, axis=1, keepdims=True) / len_f     # (Bb, 1, D)
    centered = x - mean                                         # (Bb, T, D)
    var = jnp.sum((centered * mask) ** 2, axis=1, keepdims=True) / len_f
    std = jnp.sqrt(var)                                         # (Bb, 1, D)

    # Fused epilogue: exact (Bb,1,D)-wide divide, then sub + FMA per element.
    scale = sb_ref[:, 0:1, :].astype(jnp.float32)               # (Bb, 1, D)
    bias = sb_ref[:, 1:2, :].astype(jnp.float32)                # (Bb, 1, D)
    scale_eff = scale / (std + 1e-5)                            # (Bb, 1, D)

    o_ref[...] = (centered * scale_eff + bias).astype(o_ref.dtype)


def adaptive_norm(xs, x_lens, styles, weight, *, block_b=None):
    """xs: (B, T, D), x_lens: (B,) int, styles: (B, S),
    weight: (2D, S) float (PyTorch nn.Linear layout, no bias)."""
    B, T, D = xs.shape

    # Affine layer hoisted out of the kernel: one real (B,S)x(S,2D) matmul.
    coeff = jnp.dot(styles.astype(jnp.float32), weight.T.astype(jnp.float32),
                    preferred_element_type=jnp.float32)          # (B, 2D)
    scale_bias = coeff.reshape(B, 2, D)                          # [scale; bias]
    lens = x_lens.astype(jnp.int32).reshape(B, 1, 1)

    itemsize = jnp.dtype(xs.dtype).itemsize
    row_f32_bytes = T * D * 4
    if block_b is None:
        # Cap block_b by a VMEM budget (~4 MiB of f32 working tile per step)
        # so double-buffered in/out blocks + temporaries stay well inside
        # every generation's VMEM and the grid keeps multiple steps for
        # pipelining / megacore sharding at large B.
        block_b = max(1, min(B, (4 << 20) // max(row_f32_bytes, 1)))
    while B % block_b:
        block_b -= 1
    grid = (B // block_b,)

    in_block_bytes = block_b * T * D * itemsize
    f32_block_bytes = block_b * row_f32_bytes
    # ~2x in + 2x out (double-buffered) + a few f32-sized temporaries, with
    # margin; keep headroom below v7x's 64 MiB physical VMEM.
    est = 2 * (4 * in_block_bytes + 4 * f32_block_bytes)
    vmem_limit = int(min(48 * 2**20, max(32 * 2**20, est)))

    return pl.pallas_call(
        adaptive_norm_kernel,
        out_shape=jax.ShapeDtypeStruct((B, T, D), xs.dtype),
        grid=grid,
        in_specs=[
            pl.BlockSpec((block_b, T, D), lambda b: (b, 0, 0)),   # xs
            pl.BlockSpec((block_b, 1, 1), lambda b: (b, 0, 0)),   # lens
            pl.BlockSpec((block_b, 2, D), lambda b: (b, 0, 0)),   # scale/bias
        ],
        out_specs=pl.BlockSpec((block_b, T, D), lambda b: (b, 0, 0)),
        compiler_params=pltpu.CompilerParams(
            dimension_semantics=("parallel",),
            vmem_limit_bytes=vmem_limit),
    )(xs, lens, scale_bias)


def adaptive_norm_ref(xs, x_lens, styles, weight):
    """Pure-JAX reference for validation."""
    coeff = styles @ weight.T                          # (B, 2D)
    D = xs.shape[-1]
    scale, bias = coeff[:, :D], coeff[:, D:]
    mask = (jnp.arange(xs.shape[1])[None, :] < x_lens[:, None]).astype(xs.dtype)
    mask = mask[:, :, None]                            # (B, T, 1)
    lens = x_lens.astype(xs.dtype)[:, None, None]
    mean = jnp.sum(xs * mask, axis=1, keepdims=True) / lens
    var = jnp.sum(((xs - mean) * mask) ** 2, axis=1, keepdims=True) / lens
    std = jnp.sqrt(var)
    y = (xs - mean) / (std + 1e-5)
    return scale[:, None, :] * y + bias[:, None, :]


if __name__ == "__main__":
    B, T, D, S = 2, 8, 32, 16   # batch, seq, d_model, style_dim

    key = jax.random.PRNGKey(0)
    k_x, k_s, k_w = jax.random.split(key, 3)

    xs = jax.random.normal(k_x, (B, T, D), dtype=jnp.float32)
    styles = jax.random.normal(k_s, (B, S), dtype=jnp.float32)
    x_lens = jnp.array([8, 5], dtype=jnp.int32)

    # deterministic nn.Linear(style_dim, 2*d_model, bias=False) init:
    # uniform(-1/sqrt(S), 1/sqrt(S)), weight shape (2*D, S)
    bound = 1.0 / (S ** 0.5)
    weight = jax.random.uniform(k_w, (2 * D, S), dtype=jnp.float32,
                                minval=-bound, maxval=bound)

    out = adaptive_norm(xs, x_lens, styles, weight)
    out = jax.block_until_ready(out)

    ref = adaptive_norm_ref(xs, x_lens, styles, weight)
    assert out.shape == (B, T, D)
    assert jnp.allclose(out, ref, atol=1e-3, rtol=1e-3), "mismatch vs reference"

    print("KERNEL_OK")
</pallas_src>

<mosaic_0001>
module attributes {stable_mosaic.version = 11 : i64} {
  func.func @adaptive_norm_kernel(%arg0: i32, %arg1: memref<2x8x32xf32, #tpu.memory_space<vmem>>, %arg2: memref<2x1x1xi32, #tpu.memory_space<vmem>>, %arg3: memref<2x2x32xf32, #tpu.memory_space<vmem>>, %arg4: memref<2x8x32xf32, #tpu.memory_space<vmem>>) attributes {dimension_semantics = [#tpu.dimension_semantics<parallel>], iteration_bounds = array<i64: 1>, scalar_prefetch = 0 : i64, scratch_operands = 0 : i64, tpu.core_type = #tpu.core_type<tc>, window_params = [{transform_indices = @transform_0, window_bounds = array<i64: 2, 8, 32>}, {transform_indices = @transform_1, window_bounds = array<i64: 2, 1, 1>}, {transform_indices = @transform_2, window_bounds = array<i64: 2, 2, 32>}, {transform_indices = @transform_3, window_bounds = array<i64: 2, 8, 32>}]} {
    %c0 = arith.constant 0 : index
    %c0_0 = arith.constant 0 : index
    %c0_1 = arith.constant 0 : index
    %0 = vector.load %arg1[%c0, %c0_0, %c0_1] : memref<2x8x32xf32, #tpu.memory_space<vmem>>, vector<2x8x32xf32>
    %c0_2 = arith.constant 0 : index
    %c0_3 = arith.constant 0 : index
    %c0_4 = arith.constant 0 : index
    %1 = vector.load %arg2[%c0_2, %c0_3, %c0_4] : memref<2x1x1xi32, #tpu.memory_space<vmem>>, vector<2x1x1xi32>
    %2 = tpu.iota {dimensions = array<i32: 1>} : vector<1x8x32xi32>
    %3 = vector.broadcast %2 : vector<1x8x32xi32> to vector<2x8x32xi32>
    %4 = vector.broadcast %1 : vector<2x1x1xi32> to vector<2x8x32xi32>
    %5 = arith.cmpi slt, %3, %4 : vector<2x8x32xi32>
    %6 = arith.extui %5 : vector<2x8x32xi1> to vector<2x8x32xi32>
    %7 = arith.sitofp %6 : vector<2x8x32xi32> to vector<2x8x32xf32>
    %8 = arith.sitofp %1 : vector<2x1x1xi32> to vector<2x1x1xf32>
    %cst = arith.constant 1.000000e+00 : f32
    %9 = vector.broadcast %cst : f32 to vector<2x1x1xf32>
    %10 = arith.maximumf %8, %9 : vector<2x1x1xf32>
    %11 = arith.mulf %0, %7 : vector<2x8x32xf32>
    %cst_5 = arith.constant dense<0.000000e+00> : vector<2x32xf32>
    %12 = vector.multi_reduction <add>, %11, %cst_5 [1] : vector<2x8x32xf32> to vector<2x32xf32>
    %13 = vector.shape_cast %12 : vector<2x32xf32> to vector<2x1x32xf32>
    %14 = vector.broadcast %10 : vector<2x1x1xf32> to vector<2x1x32xf32>
    %15 = arith.divf %13, %14 : vector<2x1x32xf32>
    %16 = vector.broadcast %15 : vector<2x1x32xf32> to vector<2x8x32xf32>
    %17 = arith.subf %0, %16 : vector<2x8x32xf32>
    %18 = arith.mulf %17, %7 : vector<2x8x32xf32>
    %19 = arith.mulf %18, %18 : vector<2x8x32xf32>
    %cst_6 = arith.constant dense<0.000000e+00> : vector<2x32xf32>
    %20 = vector.multi_reduction <add>, %19, %cst_6 [1] : vector<2x8x32xf32> to vector<2x32xf32>
    %21 = vector.shape_cast %20 : vector<2x32xf32> to vector<2x1x32xf32>
    %22 = vector.broadcast %10 : vector<2x1x1xf32> to vector<2x1x32xf32>
    %23 = arith.divf %21, %22 : vector<2x1x32xf32>
    %24 = math.sqrt %23 : vector<2x1x32xf32>
    %c0_7 = arith.constant 0 : index
    %c0_8 = arith.constant 0 : index
    %c0_9 = arith.constant 0 : index
    %25 = vector.load %arg3[%c0_7, %c0_8, %c0_9] : memref<2x2x32xf32, #tpu.memory_space<vmem>>, vector<2x1x32xf32>
    %c0_10 = arith.constant 0 : index
    %c1 = arith.constant 1 : index
    %c0_11 = arith.constant 0 : index
    %26 = vector.load %arg3[%c0_10, %c1, %c0_11] : memref<2x2x32xf32, #tpu.memory_space<vmem>>, vector<2x1x32xf32>
    %cst_12 = arith.constant 9.99999974E-6 : f32
    %27 = vector.broadcast %cst_12 : f32 to vector<2x1x32xf32>
    %28 = arith.addf %24, %27 : vector<2x1x32xf32>
    %29 = arith.divf %25, %28 : vector<2x1x32xf32>
    %30 = vector.broadcast %29 : vector<2x1x32xf32> to vector<2x8x32xf32>
    %31 = arith.mulf %17, %30 : vector<2x8x32xf32>
    %32 = vector.broadcast %26 : vector<2x1x32xf32> to vector<2x8x32xf32>
    %33 = arith.addf %31, %32 : vector<2x8x32xf32>
    %c0_13 = arith.constant 0 : index
    %c0_14 = arith.constant 0 : index
    %c0_15 = arith.constant 0 : index
    %34 = vector.load %arg4[%c0_13, %c0_14, %c0_15] : memref<2x8x32xf32, #tpu.memory_space<vmem>>, vector<2x8x32xf32>
    tpu.vector_store %arg4[%c0_13, %c0_14, %c0_15], %33 {strides = array<i32>} : memref<2x8x32xf32, #tpu.memory_space<vmem>>, vector<2x8x32xf32>,
    return
  }
  func.func @transform_0(%arg0: i32) -> (i32, i32, i32) {
    %c0_i32 = arith.constant 0 : i32
    %c0_i32_0 = arith.constant 0 : i32
    %c0_i32_1 = arith.constant 0 : i32
    return %arg0, %c0_i32, %c0_i32_0 : i32, i32, i32
  }
  func.func @transform_1(%arg0: i32) -> (i32, i32, i32) {
    %c0_i32 = arith.constant 0 : i32
    %c0_i32_0 = arith.constant 0 : i32
    %c0_i32_1 = arith.constant 0 : i32
    return %arg0, %c0_i32, %c0_i32_0 : i32, i32, i32
  }
  func.func @transform_2(%arg0: i32) -> (i32, i32, i32) {
    %c0_i32 = arith.constant 0 : i32
    %c0_i32_0 = arith.constant 0 : i32
    %c0_i32_1 = arith.constant 0 : i32
    return %arg0, %c0_i32, %c0_i32_0 : i32, i32, i32
  }
  func.func @transform_3(%arg0: i32) -> (i32, i32, i32) {
    %c0_i32 = arith.constant 0 : i32
    %c0_i32_0 = arith.constant 0 : i32
    %c0_i32_1 = arith.constant 0 : i32
    return %arg0, %c0_i32, %c0_i32_0 : i32, i32, i32
  }
}

</mosaic_0001>

<bundles_post_ra>
// kernel: tpu_custom_call.1
= control target key start
LH: loop header
LB: loop body
LE: loop exit
PB: predicated region body
PF: predicated region fallthrough
CT: control target
= control target key end

     0   :  { %8 = vsyncpa [#allocation3], 0  ;;  %s343_s0 = inlined_call_operand.hbm [shape: f32[2,8,32], index: 0, kind: input, shape index: {}]   ;;  %s344_s1 = inlined_call_operand.vmem [shape: s32[2,1,1], index: 1, kind: input, shape index: {}]   ;;  %s345_s2 = inlined_call_operand.vmem [shape: f32[2,2,32], index: 2, kind: input, shape index: {}]   ;;  %s346_s3 = inlined_call_operand.hbm [shape: f32[2,8,32], index: 3, kind: output, shape index: {}]  }
   0x1   :  { %9 = vsyncpa [#allocation4], 0  ;;  %s255_s12 = smov [#allocation2]   ;;  %s207_s16 = scalar_lea.hbm %s343_s0, 256 }
   0x2   :  { %s15_s13 = sshll.u32 %s255_s12, 4  ;;  %p208_p0 = scmp.ne.s32.totalorder %s343_s0, %s207_s16  ;;  %s16_s13 = int_to_ptr.vmem [resolvable:$true] %s15_s13 }
   0x3   :  { %p211_p1 = scmp.lt.u32.totalorder %s207_s16, %s343_s0 }
   0x5   :  { %p213_p2 = pnand %p211_p1, %p208_p0 }
   0x7   :  { %216 = shalt.err (!%p213_p2)
}
   0x8   :  { %s217_s21 = scalar_lea.vmem %s16_s13, 256  ;;  %p222_p4 = scmp.lt.s32.totalorder %s16_s13, %s16_s13 }
   0x9   :  { %p218_p3 = scmp.ne.s32.totalorder %s16_s13, %s217_s21  ;;  %p223_p5 = scmp.lt.s32.totalorder %s217_s21, %s217_s21 }
   0xb   :  { %p224_p6 = por %p223_p5, %p222_p4 }
   0xd   :  { %p225_p7 = pnand %p224_p6, %p218_p3 }
   0xf   :  { %228 = shalt.err (!%p225_p7)
}
  0x10   :  { %s256_s22 = smov 128   ;;  %s257_s23 = smov 8  }
  0x11   :  { %21 = dma.hbm_to_vmem [thread:$0]  %s343_s0, 256, %s16_s13, [#allocation3], %s256_s22, %s256_s22, %s257_s23  }
  0x12   :  { %251 = dma.done.wait [#allocation3], 256  }
  0x13   :  { %252 = vsyncadd [#allocation3], 4294967040  ;;  %v33_v0 = vlaneseq  ;;  %v258_v1 = vmov 0   ;;  %v31_v4 = vld [vmem:[%s344_s1] sm:$0x1]  ;;  %vm61_vm1 = vcmask 261120  }
  0x14   :  { %193 = vset.pattern.permute.xlu0 %v258_v1  ;;  %194 = vset.pattern.permute.xlu1 %v258_v1  ;;  %v32_v5 = vld [vmem:[%s344_s1 + $0x1] sm:$0x1]  ;;  %v55_v7 = vcvt.s32.f32 %v31_v4  ;;  %v259_v14 = vmov 0.0   ;;  %v30_v20 = vld [vmem:[#allocation2 + $0x8] sm:$0xff]  ;;  %s260_s9 = smov [#allocation5]  }
  0x15   :  { %v34_v2 = vshrl.u32 %v33_v0, 7  ;;  %v56_v8 = vcvt.s32.f32 %v32_v5  ;;  %v29_v13 = vld [vmem:[#allocation2] sm:$0xff]  ;;  %s171_s10 = sshll.u32 %s260_s9, 4  ;;  %s172_s10 = int_to_ptr.vmem [resolvable:$true] %s171_s10 }
  0x16   :  { %v57_v9 = vmax.f32 %v55_v7, 1.0  ;;  %s229_s11 = scalar_lea.vmem %s172_s10, 256  ;;  %p234_p9 = scmp.lt.s32.totalorder %s172_s10, %s172_s10 }
  0x17   :  { %v296_v3 = vsub.s32 0, %v34_v2  ;;  %v58_v11 = vmax.f32 %v56_v8, 1.0  ;;  %p230_p8 = scmp.ne.s32.totalorder %s172_s10, %s229_s11  ;;  %p235_p10 = scmp.lt.s32.totalorder %s229_s11, %s229_s11 }
  0x18   :  { %78 = vperm.xlu1 %194, %v57_v9  }
  0x19   :  { %v38_v6 = vrot.slane %v31_v4, %v296_v3  ;;  %v42_v10 = vrot.slane %v32_v5, %v296_v3  ;;  %p236_p11 = por %p235_p10, %p234_p9 }
  0x1b   :  { %44 = vperm.xlu0 %193, %v38_v6   ;;  %p237_p12 = pnand %p236_p11, %p230_p8 }
  0x1c   :  { %87 = vperm.xlu1 %194, %v58_v11  }
  0x1f   :  { %47 = vperm.xlu0 %193, %v42_v10  }
  0x97   :  { %v79_v16 = vpop.permute.xlu1 %78 }
  0x98   :  { %v84_v18 = vrot.slane %v79_v16, %v296_v3 }
  0x9a   :  { %v45_v12 = vpop.permute.xlu0 %44  ;;  %195 = vrcp.f32 %v84_v18 }
  0x9b   :  { %vm49_vm0 = vcmp.lt.s32.totalorder %v34_v2, %v45_v12  ;;  %v88_v24 = vpop.permute.xlu1 %87 }
  0x9c   :  { %v183_v15 = vsel %vm49_vm0, 1.0, %v259_v14  ;;  %v93_v26 = vrot.slane %v88_v24, %v296_v3 }
  0x9d   :  { %v59_v17 = vmul.f32 %v183_v15, %v29_v13 }
  0x9e   :  { %v48_v19 = vpop.permute.xlu0 %47  ;;  %197 = vrcp.f32 %v93_v26 }
  0x9f   :  { %v62_v21 = vsel %vm61_vm1, %v59_v17, 0.0  ;;  %vm50_vm2 = vcmp.lt.s32.totalorder %v34_v2, %v48_v19  ;;  %v135_v17 = vld [vmem:[%s345_s2 + $0x2] sm:$0x1] }
  0xa0   :  { %v63_v22 = vrot.slane %v62_v21, 4  ;;  %v184_v23 = vsel %vm50_vm2, 1.0, %v259_v14  ;;  %v134_v14 = vld [vmem:[%s345_s2] sm:$0x1] }
  0xa1   :  { %v60_v25 = vmul.f32 %v184_v23, %v30_v20 }
  0xa2   :  { %v64_v27 = vadd.f32 %v63_v22, %v62_v21 }
  0xa3   :  { %v69_v28 = vsel %vm61_vm1, %v60_v25, 0.0  ;;  %v186_v25 = vld [vmem:[%s345_s2 + $0x3] ss:$0 sm:$0xff] }
  0xa4   :  { %v65_v29 = vrot.slane %v64_v27, 2  ;;  %v70_v30 = vrot.slane %v69_v28, 4  ;;  %v196_v35 = vpop.eup %195 }
  0xa6   :  { %v66_v31 = vadd.f32 %v65_v29, %v64_v27  ;;  %v71_v32 = vadd.f32 %v70_v30, %v69_v28 }
  0xa8   :  { %v67_v33 = vrot.slane %v66_v31, 1  ;;  %v72_v34 = vrot.slane %v71_v32, 2  ;;  %v198_v42 = vpop.eup %197 }
  0xaa   :  { %v68_v36 = vadd.f32 %v67_v33, %v66_v31  ;;  %v73_v37 = vadd.f32 %v72_v34, %v71_v32 }
  0xac   :  { %v95_v38 = vmul.f32 %v196_v35, %v68_v36  ;;  %v74_v39 = vrot.slane %v73_v37, 1 }
  0xae   :  { %v98_v40 = vsub.f32 %v29_v13, %v95_v38  ;;  %v75_v41 = vadd.f32 %v74_v39, %v73_v37 }
  0xb0   :  { %v100_v43 = vmul.f32 %v183_v15, %v98_v40  ;;  %v97_v44 = vmul.f32 %v198_v42, %v75_v41 }
  0xb2   :  { %v102_v45 = vmul.f32 %v100_v43, %v100_v43  ;;  %v99_v46 = vsub.f32 %v30_v20, %v97_v44  ;;  %v185_v20 = vld [vmem:[%s345_s2 + $0x1] ss:$0 sm:$0xff] }
  0xb4   :  { %v104_v47 = vsel %vm61_vm1, %v102_v45, 0.0  ;;  %v101_v48 = vmul.f32 %v184_v23, %v99_v46 }
  0xb5   :  { %v105_v49 = vrot.slane %v104_v47, 4 }
  0xb6   :  { %v103_v50 = vmul.f32 %v101_v48, %v101_v48 }
  0xb7   :  { %v106_v51 = vadd.f32 %v105_v49, %v104_v47 }
  0xb8   :  { %v111_v52 = vsel %vm61_vm1, %v103_v50, 0.0 }
  0xb9   :  { %v107_v53 = vrot.slane %v106_v51, 2  ;;  %v112_v54 = vrot.slane %v111_v52, 4 }
  0xbb   :  { %v108_v55 = vadd.f32 %v107_v53, %v106_v51  ;;  %v113_v56 = vadd.f32 %v112_v54, %v111_v52 }
  0xbd   :  { %v109_v57 = vrot.slane %v108_v55, 1  ;;  %v114_v58 = vrot.slane %v113_v56, 2 }
  0xbf   :  { %v110_v59 = vadd.f32 %v109_v57, %v108_v55  ;;  %v115_v60 = vadd.f32 %v114_v58, %v113_v56 }
  0xc1   :  { %v118_v61 = vmul.f32 %v196_v35, %v110_v59  ;;  %v116_v62 = vrot.slane %v115_v60, 1 }
  0xc3   :  { %199 = vrsqrt.f32 %v118_v61  ;;  %v117_v63 = vadd.f32 %v116_v62, %v115_v60  ;;  %vm122_vm3 = vcmp.eq.f32.partialorder %v118_v61, inf  ;;  %v125_v4 = vand.u32 2147483648, %v118_v61 }
  0xc4   :  { %vm124_vm4 = vcmp.eq.f32.partialorder %v118_v61, 0.0 }
  0xc5   :  { %v119_v0 = vmul.f32 %v198_v42, %v117_v63 }
  0xc7   :  { %201 = vrsqrt.f32 %v119_v0  ;;  %vm129_vm5 = vcmp.eq.f32.partialorder %v119_v0, inf  ;;  %v132_v10 = vand.u32 2147483648, %v119_v0  ;;  %vm131_vm6 = vcmp.eq.f32.partialorder %v119_v0, 0.0 }
  0xcd   :  { %v200_v1 = vpop.eup %199 }
  0xce   :  { %v121_v2 = vmul.f32 %v200_v1, %v118_v61 }
  0xd0   :  { %v123_v5 = vsel %vm122_vm3, %v118_v61, %v121_v2 }
  0xd1   :  { %v202_v6 = vpop.eup %201  ;;  %v126_v7 = vsel %vm124_vm4, %v125_v4, %v123_v5 }
  0xd2   :  { %v128_v8 = vmul.f32 %v202_v6, %v119_v0  ;;  %v138_v9 = vadd.f32 1e-05, %v126_v7 }
  0xd4   :  { %v130_v11 = vsel %vm129_vm5, %v119_v0, %v128_v8  ;;  %203 = vrcp.f32 %v138_v9 }
  0xd5   :  { %v133_v12 = vsel %vm131_vm6, %v132_v10, %v130_v11 }
  0xd6   :  { %v139_v13 = vadd.f32 1e-05, %v133_v12 }
  0xd8   :  { %205 = vrcp.f32 %v139_v13 }
  0xde   :  { %v204_v15 = vpop.eup %203 }
  0xdf   :  { %v141_v16 = vmul.f32 %v204_v15, %v134_v14 }
  0xe1   :  { %v147_v18 = vrot.slane %v141_v16, %v296_v3 }
  0xe2   :  { %v206_v19 = vpop.eup %205 }
  0xe3   :  { %v143_v21 = vmul.f32 %v206_v19, %v135_v17  ;;  %v152_v22 = vmul.f32 %v147_v18, %v98_v40 }
  0xe5   :  { %v151_v23 = vrot.slane %v143_v21, %v296_v3  ;;  %v162_v24 = vadd.f32 %v185_v20, %v152_v22 }
  0xe7   :  { %v153_v26 = vmul.f32 %v151_v23, %v99_v46  ;;  %164 = vst.msk [vmem:[#allocation5] sm:$0xff] %vm61_vm1, %v162_v24 }
  0xe9   :  { %v163_v27 = vadd.f32 %v186_v25, %v153_v26 }
  0xeb   :  { %165 = vst.msk [vmem:[#allocation5 + $0x8] sm:$0xff] %vm61_vm1, %v163_v27 }
  0xec   :  { %240 = shalt.err (!%p237_p12)
}
  0xed   :  { %s241_s2 = scalar_lea.hbm %s346_s3, 256 }
  0xee   :  { %p242_p13 = scmp.ne.s32.totalorder %s346_s3, %s241_s2  ;;  %p245_p0 = scmp.lt.u32.totalorder %s241_s2, %s346_s3 }
  0xf0   :  { %p247_p1 = pnand %p245_p0, %p242_p13 }
  0xf2   :  { %250 = shalt.err (!%p247_p1)
}
  0xf3   :  { %177 = dma.vmem_to_hbm [thread:$0]  %s172_s10, 256, %s346_s3, [#allocation4], %s256_s22, %s256_s22, %s257_s23  }
  0xf4   :  { %253 = dma.done.wait [#allocation4], 256  }
  0xf5   :  { %254 = vsyncadd [#allocation4], 4294967040 }
  0xf6   :  { %181 = vsyncpa [#allocation3], 1 }
  0xf7   :  { %182 = vsyncpa [#allocation4], 1 }

</bundles_post_ra>
